<compile_context>
chip_gen: v7x
topology: tpu7x:2x2x1
jax: 0.10.0
libtpu: 0.0.40
codegen_flags: <defaults>
</compile_context>

<pallas_src>
import functools

import jax
import jax.numpy as jnp
from jax import lax
from jax.experimental import pallas as pl
from jax.experimental.pallas import tpu as pltpu

# PyTorch F.pairwise_distance default eps (added to the signed difference before the norm).
_PAIRWISE_EPS = 1e-6

# Budget for the 3 inputs x 2 pipeline buffers of (TB, D) tiles. Kept well under
# the v7x 64 MiB physical VMEM (and under v5e/v6e scoped limits once raised).
_INPUT_VMEM_BUDGET_BYTES = 24 * 1024 * 1024
_MAX_BLOCK_B = 1024  # diminishing returns past ~512-1024 rows per tile


def _pow_p(d, p_norm):
    """|d|^p specialized for cheap integer powers (avoids EUP pow)."""
    if p_norm == 2:
        return d * d
    if p_norm == 1:
        return jnp.abs(d)
    if isinstance(p_norm, int) and p_norm > 0:
        ad = jnp.abs(d)
        out = ad
        for _ in range(p_norm - 1):
            out = out * ad
        return out
    return jnp.abs(d) ** p_norm


def _triplet_loss_kernel(a_ref, p_ref, n_ref, loss_ref, acc_ref,
                         *, margin, p_norm, batch, block_b):
    i = pl.program_id(0)

    @pl.when(i == 0)
    def _init():
        acc_ref[...] = jnp.zeros_like(acc_ref)

    # Tiles are streamed in their HBM dtype; cast per tile for f32 accumulation.
    a = a_ref[...].astype(jnp.float32)
    pos = p_ref[...].astype(jnp.float32)
    neg = n_ref[...].astype(jnp.float32)

    d1 = a - pos + _PAIRWISE_EPS
    d2 = a - neg + _PAIRWISE_EPS

    # pow(||x - y + eps||_p, p) == sum(|x - y + eps|^p, axis=-1).
    # Fuse the two distances into ONE axis=-1 reduction:
    #   s1 - s2 == sum(|d1|^p - |d2|^p, axis=-1)
    diff = _pow_p(d1, p_norm) - _pow_p(d2, p_norm)            # (TB, D)
    s = jnp.sum(diff, axis=-1, keepdims=True)                 # (TB, 1)
    hinge = jnp.maximum(s + jnp.float32(margin), 0.0)         # (TB, 1)

    # Mask padded rows of a ragged last tile so the mean stays unbiased.
    if batch % block_b != 0:
        row = i * block_b + lax.broadcasted_iota(jnp.int32, hinge.shape, 0)
        hinge = jnp.where(row < batch, hinge, 0.0)

    # Pure VPU add into the resident per-row accumulator; the cross-sublane
    # reduction happens exactly once, in the finalize step.
    acc_ref[...] += hinge

    @pl.when(i == pl.num_programs(0) - 1)
    def _finalize():
        # Divide by the TRUE batch size (not num_tiles * block_b).
        loss_ref[0, 0] = jnp.sum(acc_ref[...]) / jnp.float32(batch)


def _pick_block_b(batch, dim, itemsize):
    """Largest batch tile such that 3 inputs x 2 buffers fit the VMEM budget."""
    tb = _INPUT_VMEM_BUDGET_BYTES // (6 * dim * itemsize)
    tb = max(min(tb, _MAX_BLOCK_B), 8)
    if tb >= batch:
        return batch                      # full-dim block (no (8) alignment needed)
    return max((tb // 8) * 8, 8)          # sublane-aligned tile


def triplet_loss(z_anchor, z_positive, z_negative, *, margin=1.0, p_norm=2,
                 block_b=None):
    """Mean-reduced triplet loss over (B, D) embeddings (matches the PyTorch module)."""
    assert z_anchor.shape == z_positive.shape == z_negative.shape
    assert z_anchor.ndim == 2
    B, D = z_anchor.shape
    itemsize = jnp.dtype(z_anchor.dtype).itemsize

    if block_b is None:
        block_b = _pick_block_b(B, D, itemsize)
    block_b = min(block_b, B)
    if block_b < B:
        block_b = max((block_b // 8) * 8, 8)

    num_tiles = pl.cdiv(B, block_b)

    kernel = functools.partial(_triplet_loss_kernel, margin=margin, p_norm=p_norm,
                               batch=B, block_b=block_b)

    # Double-buffered input tiles plus headroom for in-kernel temporaries,
    # capped at 48 MiB so it stays safe on v7x's 64 MiB VMEM.
    in_buffer_bytes = 3 * 2 * block_b * D * itemsize
    vmem_limit = int(min(48 * 1024 * 1024, max(16 * 1024 * 1024, 2 * in_buffer_bytes)))

    in_spec = pl.BlockSpec((block_b, D), lambda i: (i, 0))

    loss = pl.pallas_call(
        kernel,
        out_shape=jax.ShapeDtypeStruct((1, 1), jnp.float32),
        grid=(num_tiles,),
        in_specs=[in_spec, in_spec, in_spec],
        out_specs=pl.BlockSpec(memory_space=pltpu.SMEM),
        scratch_shapes=[pltpu.VMEM((block_b, 1), jnp.float32)],
        compiler_params=pltpu.CompilerParams(
            dimension_semantics=("arbitrary",),   # accumulator carries across the grid
            vmem_limit_bytes=vmem_limit,
        ),
    )(z_anchor, z_positive, z_negative)
    return loss[0, 0]


def _reference(a, p, n, margin=1.0, p_norm=2):
    """Pure-JAX mirror of the PyTorch forward."""
    d1 = jnp.sum(jnp.abs(a - p + _PAIRWISE_EPS) ** p_norm, axis=-1)
    d2 = jnp.sum(jnp.abs(a - n + _PAIRWISE_EPS) ** p_norm, axis=-1)
    return jnp.mean(jnp.maximum(d1 - d2 + margin, 0.0))


if __name__ == "__main__":
    key = jax.random.PRNGKey(0)

    # Case 1: small embedding batch matching the module's typical use (single tile).
    k_a, k_p, k_n = jax.random.split(key, 3)
    B, D = 8, 32
    z_anchor = jax.random.normal(k_a, (B, D), dtype=jnp.float32)
    z_positive = jax.random.normal(k_p, (B, D), dtype=jnp.float32)
    z_negative = jax.random.normal(k_n, (B, D), dtype=jnp.float32)

    loss = triplet_loss(z_anchor, z_positive, z_negative, margin=1.0, p_norm=2)
    jax.block_until_ready(loss)
    expected = _reference(z_anchor, z_positive, z_negative, margin=1.0, p_norm=2)
    assert jnp.allclose(loss, expected, rtol=1e-5, atol=1e-5), (loss, expected)

    # Case 2: exercise the tiled/pipelined path with a ragged last tile.
    k_a2, k_p2, k_n2 = jax.random.split(jax.random.PRNGKey(1), 3)
    B2, D2 = 20, 256
    a2 = jax.random.normal(k_a2, (B2, D2), dtype=jnp.float32)
    p2 = jax.random.normal(k_p2, (B2, D2), dtype=jnp.float32)
    n2 = jax.random.normal(k_n2, (B2, D2), dtype=jnp.float32)

    loss2 = triplet_loss(a2, p2, n2, margin=0.5, p_norm=2, block_b=8)
    jax.block_until_ready(loss2)
    expected2 = _reference(a2, p2, n2, margin=0.5, p_norm=2)
    assert jnp.allclose(loss2, expected2, rtol=1e-5, atol=1e-5), (loss2, expected2)

    # Case 3: p=1 path and bf16 inputs (native-dtype streaming, f32 accumulation).
    k_a3, k_p3, k_n3 = jax.random.split(jax.random.PRNGKey(2), 3)
    B3, D3 = 16, 128
    a3 = jax.random.normal(k_a3, (B3, D3), dtype=jnp.bfloat16)
    p3 = jax.random.normal(k_p3, (B3, D3), dtype=jnp.bfloat16)
    n3 = jax.random.normal(k_n3, (B3, D3), dtype=jnp.bfloat16)

    loss3 = triplet_loss(a3, p3, n3, margin=1.0, p_norm=1)
    jax.block_until_ready(loss3)
    expected3 = _reference(a3.astype(jnp.float32), p3.astype(jnp.float32),
                           n3.astype(jnp.float32), margin=1.0, p_norm=1)
    assert jnp.allclose(loss3, expected3, rtol=2e-2, atol=2e-2), (loss3, expected3)

    print("KERNEL_OK")
</pallas_src>

<mosaic_0001>
module attributes {stable_mosaic.version = 11 : i64} {
  func.func @_triplet_loss_kernel(%arg0: i32, %arg1: memref<8x32xf32, #tpu.memory_space<vmem>>, %arg2: memref<8x32xf32, #tpu.memory_space<vmem>>, %arg3: memref<8x32xf32, #tpu.memory_space<vmem>>, %arg4: memref<1x1xf32, #tpu.memory_space<smem>>, %arg5: memref<8x1xf32, #tpu.memory_space<vmem>>) attributes {dimension_semantics = [#tpu.dimension_semantics<arbitrary>], iteration_bounds = array<i64: 1>, scalar_prefetch = 0 : i64, scratch_operands = 1 : i64, tpu.core_type = #tpu.core_type<tc>, window_params = [{transform_indices = @transform_0, window_bounds = array<i64: 8, 32>}, {transform_indices = @transform_1, window_bounds = array<i64: 8, 32>}, {transform_indices = @transform_2, window_bounds = array<i64: 8, 32>}, {transform_indices = @transform_3, window_bounds = array<i64: 1, 1>}]} {
    %c0_i32 = arith.constant 0 : i32
    %0 = arith.cmpi eq, %arg0, %c0_i32 : i32
    %1 = arith.extui %0 : i1 to i32
    %c0_i32_0 = arith.constant 0 : i32
    %2 = arith.cmpi ne, %1, %c0_i32_0 : i32
    scf.if %2 {
      %cst_16 = arith.constant 0.000000e+00 : f32
      %27 = vector.broadcast %cst_16 : f32 to vector<8x1xf32>
      %c0_17 = arith.constant 0 : index
      %c0_18 = arith.constant 0 : index
      %28 = vector.load %arg5[%c0_17, %c0_18] : memref<8x1xf32, #tpu.memory_space<vmem>>, vector<8x1xf32>
      tpu.vector_store %arg5[%c0_17, %c0_18], %27 {strides = array<i32>} : memref<8x1xf32, #tpu.memory_space<vmem>>, vector<8x1xf32>,
    } else {
    }
    %c0 = arith.constant 0 : index
    %c0_1 = arith.constant 0 : index
    %3 = vector.load %arg1[%c0, %c0_1] : memref<8x32xf32, #tpu.memory_space<vmem>>, vector<8x32xf32>
    %c0_2 = arith.constant 0 : index
    %c0_3 = arith.constant 0 : index
    %4 = vector.load %arg2[%c0_2, %c0_3] : memref<8x32xf32, #tpu.memory_space<vmem>>, vector<8x32xf32>
    %c0_4 = arith.constant 0 : index
    %c0_5 = arith.constant 0 : index
    %5 = vector.load %arg3[%c0_4, %c0_5] : memref<8x32xf32, #tpu.memory_space<vmem>>, vector<8x32xf32>
    %6 = arith.subf %3, %4 : vector<8x32xf32>
    %cst = arith.constant 9.99999997E-7 : f32
    %7 = vector.broadcast %cst : f32 to vector<8x32xf32>
    %8 = arith.addf %6, %7 : vector<8x32xf32>
    %9 = arith.subf %3, %5 : vector<8x32xf32>
    %cst_6 = arith.constant 9.99999997E-7 : f32
    %10 = vector.broadcast %cst_6 : f32 to vector<8x32xf32>
    %11 = arith.addf %9, %10 : vector<8x32xf32>
    %12 = arith.mulf %8, %8 : vector<8x32xf32>
    %13 = arith.mulf %11, %11 : vector<8x32xf32>
    %14 = arith.subf %12, %13 : vector<8x32xf32>
    %cst_7 = arith.constant dense<0.000000e+00> : vector<8xf32>
    %15 = vector.multi_reduction <add>, %14, %cst_7 [1] : vector<8x32xf32> to vector<8xf32>
    %16 = vector.shape_cast %15 : vector<8xf32> to vector<8x1xf32>
    %cst_8 = arith.constant 1.000000e+00 : f32
    %17 = vector.broadcast %cst_8 : f32 to vector<8x1xf32>
    %18 = arith.addf %16, %17 : vector<8x1xf32>
    %cst_9 = arith.constant 0.000000e+00 : f32
    %19 = vector.broadcast %cst_9 : f32 to vector<8x1xf32>
    %20 = arith.maximumf %18, %19 : vector<8x1xf32>
    %c0_10 = arith.constant 0 : index
    %c0_11 = arith.constant 0 : index
    %21 = vector.load %arg5[%c0_10, %c0_11] : memref<8x1xf32, #tpu.memory_space<vmem>>, vector<8x1xf32>
    %22 = arith.addf %21, %20 : vector<8x1xf32>
    %c0_12 = arith.constant 0 : index
    %c0_13 = arith.constant 0 : index
    %23 = vector.load %arg5[%c0_12, %c0_13] : memref<8x1xf32, #tpu.memory_space<vmem>>, vector<8x1xf32>
    tpu.vector_store %arg5[%c0_12, %c0_13], %22 {strides = array<i32>} : memref<8x1xf32, #tpu.memory_space<vmem>>, vector<8x1xf32>,
    %c0_i32_14 = arith.constant 0 : i32
    %24 = arith.cmpi eq, %arg0, %c0_i32_14 : i32
    %25 = arith.extui %24 : i1 to i32
    %c0_i32_15 = arith.constant 0 : i32
    %26 = arith.cmpi ne, %25, %c0_i32_15 : i32
    scf.if %26 {
      %c0_16 = arith.constant 0 : index
      %c0_17 = arith.constant 0 : index
      %27 = vector.load %arg5[%c0_16, %c0_17] : memref<8x1xf32, #tpu.memory_space<vmem>>, vector<8x1xf32>
      %28 = vector.shape_cast %27 : vector<8x1xf32> to vector<1x8x1xf32>
      %cst_18 = arith.constant dense<0.000000e+00> : vector<1xf32>
      %29 = vector.multi_reduction <add>, %28, %cst_18 [1, 2] : vector<1x8x1xf32> to vector<1xf32>
      %30 = vector.shape_cast %29 : vector<1xf32> to vector<1x1x1xf32>
      %31 = vector.extract %30[0, 0, 0] : f32 from vector<1x1x1xf32>
      %cst_19 = arith.constant 8.000000e+00 : f32
      %32 = arith.divf %31, %cst_19 : f32
      %c0_20 = arith.constant 0 : index
      %c0_21 = arith.constant 0 : index
      %33 = memref.load %arg4[%c0_20, %c0_21] : memref<1x1xf32, #tpu.memory_space<smem>>
      memref.store %32, %arg4[%c0_20, %c0_21] : memref<1x1xf32, #tpu.memory_space<smem>>
    } else {
    }
    return
  }
  func.func @transform_0(%arg0: i32) -> (i32, i32) {
    %c0_i32 = arith.constant 0 : i32
    %c0_i32_0 = arith.constant 0 : i32
    return %arg0, %c0_i32 : i32, i32
  }
  func.func @transform_1(%arg0: i32) -> (i32, i32) {
    %c0_i32 = arith.constant 0 : i32
    %c0_i32_0 = arith.constant 0 : i32
    return %arg0, %c0_i32 : i32, i32
  }
  func.func @transform_2(%arg0: i32) -> (i32, i32) {
    %c0_i32 = arith.constant 0 : i32
    %c0_i32_0 = arith.constant 0 : i32
    return %arg0, %c0_i32 : i32, i32
  }
  func.func @transform_3(%arg0: i32) -> (i32, i32) {
    %c0_i32 = arith.constant 0 : i32
    %c0_i32_0 = arith.constant 0 : i32
    %c0_i32_1 = arith.constant 0 : i32
    return %c0_i32, %c0_i32_0 : i32, i32
  }
}

</mosaic_0001>

<bundles_post_ra>
// kernel: tpu_custom_call.1
= control target key start
LH: loop header
LB: loop body
LE: loop exit
PB: predicated region body
PF: predicated region fallthrough
CT: control target
= control target key end

     0   :  { %8 = vsyncpa [#allocation4], 0  ;;  %s272_s0 = inlined_call_operand.hbm [shape: f32[8,32], index: 0, kind: input, shape index: {}]   ;;  %s273_s1 = inlined_call_operand.hbm [shape: f32[8,32], index: 1, kind: input, shape index: {}]   ;;  %s274_s2 = inlined_call_operand.hbm [shape: f32[8,32], index: 2, kind: input, shape index: {}]   ;;  %s275_s3 = inlined_call_operand.hbm [shape: f32[1,1], index: 3, kind: output, shape index: {}]  }
   0x1   :  { %9 = vsyncpa [#allocation7], 0 }
   0x2   :  { %10 = vsyncpa [#allocation5], 0  ;;  %s199_s12 = smov [#allocation6]   ;;  %s200_s14 = smov [#allocation3]  }
   0x3   :  { %s27_s13 = sshll.u32 %s199_s12, 4  ;;  %s17_s15 = sshll.u32 %s200_s14, 4  ;;  %s28_s13 = int_to_ptr.vmem [resolvable:$true] %s27_s13  ;;  %s18_s15 = int_to_ptr.vmem [resolvable:$true] %s17_s15 }
   0x4   :  { %s117_s18 = scalar_lea.hbm %s273_s1, 128 }
   0x5   :  { %p118_p0 = scmp.ne.s32.totalorder %s273_s1, %s117_s18  ;;  %p121_p1 = scmp.lt.u32.totalorder %s117_s18, %s273_s1 }
   0x7   :  { %p123_p2 = pnand %p121_p1, %p118_p0 }
   0x9   :  { %126 = shalt.err (!%p123_p2)
}
   0xa   :  { %s127_s23 = scalar_lea.vmem %s28_s13, 128  ;;  %p132_p4 = scmp.lt.s32.totalorder %s28_s13, %s28_s13 }
   0xb   :  { %p128_p3 = scmp.ne.s32.totalorder %s28_s13, %s127_s23  ;;  %p133_p5 = scmp.lt.s32.totalorder %s127_s23, %s127_s23 }
   0xd   :  { %p134_p6 = por %p133_p5, %p132_p4 }
   0xf   :  { %p135_p7 = pnand %p134_p6, %p128_p3 }
  0x11   :  { %138 = shalt.err (!%p135_p7)
}
  0x12   :  { %30 = dma.hbm_to_vmem [thread:$0]  %s273_s1, 128, %s28_s13, [#allocation7]  }
  0x13   :  { %s139_s28 = scalar_lea.hbm %s272_s0, 128 }
  0x14   :  { %p140_p8 = scmp.ne.s32.totalorder %s272_s0, %s139_s28  ;;  %p143_p9 = scmp.lt.u32.totalorder %s139_s28, %s272_s0 }
  0x16   :  { %p145_p10 = pnand %p143_p9, %p140_p8 }
  0x18   :  { %148 = shalt.err (!%p145_p10)
}
  0x19   :  { %s149_s6 = scalar_lea.vmem %s18_s15, 128  ;;  %p154_p12 = scmp.lt.s32.totalorder %s18_s15, %s18_s15 }
  0x1a   :  { %p150_p11 = scmp.ne.s32.totalorder %s18_s15, %s149_s6  ;;  %p155_p13 = scmp.lt.s32.totalorder %s149_s6, %s149_s6 }
  0x1c   :  { %p156_p0 = por %p155_p13, %p154_p12 }
  0x1e   :  { %p157_p1 = pnand %p156_p0, %p150_p11 }
  0x20   :  { %160 = shalt.err (!%p157_p1)
}
  0x21   :  { %20 = dma.hbm_to_vmem [thread:$0]  %s272_s0, 128, %s18_s15, [#allocation4]  }
  0x22   :  { %s201_s8 = smov [#allocation8]   ;;  %s161_s12 = scalar_lea.hbm %s274_s2, 128 }
  0x23   :  { %s37_s9 = sshll.u32 %s201_s8, 4  ;;  %p162_p2 = scmp.ne.s32.totalorder %s274_s2, %s161_s12  ;;  %s38_s9 = int_to_ptr.vmem [resolvable:$true] %s37_s9 }
  0x24   :  { %p165_p3 = scmp.lt.u32.totalorder %s161_s12, %s274_s2 }
  0x26   :  { %p167_p4 = pnand %p165_p3, %p162_p2 }
  0x28   :  { %170 = shalt.err (!%p167_p4)
}
  0x29   :  { %s171_s18 = scalar_lea.vmem %s38_s9, 128  ;;  %p176_p6 = scmp.lt.s32.totalorder %s38_s9, %s38_s9 }
  0x2a   :  { %p172_p5 = scmp.ne.s32.totalorder %s38_s9, %s171_s18  ;;  %p177_p7 = scmp.lt.s32.totalorder %s171_s18, %s171_s18 }
  0x2c   :  { %p178_p8 = por %p177_p7, %p176_p6 }
  0x2e   :  { %p179_p9 = pnand %p178_p8, %p172_p5 }
  0x30   :  { %182 = shalt.err (!%p179_p9)
}
  0x31   :  { %40 = dma.hbm_to_vmem [thread:$0]  %s274_s2, 128, %s38_s9, [#allocation7]  }
  0x32   :  { %193 = dma.done.wait [#allocation4], 128  }
  0x33   :  { %194 = vsyncadd [#allocation4], 4294967168 }
  0x34   :  { %195 = dma.done.wait [#allocation7], 256  }
  0x35   :  { %196 = vsyncadd [#allocation7], 4294967040  ;;  %v56_v0 = vld [vmem:[#allocation3] sm:$0xff]  ;;  %v57_v1 = vld [vmem:[#allocation6] sm:$0xff]  ;;  %vm66_vm0 = vcmask 261120   ;;  %vm54_vm1 = vcmask 7168  }
  0x36   :  { %v58_v2 = vld [vmem:[#allocation8] sm:$0xff]  ;;  %v59_v3 = vsub.f32 %v56_v0, %v57_v1  ;;  %v202_v11 = vmov 0.0   ;;  %s183_s22 = scalar_lea.hbm %s275_s3, 16 }
  0x37   :  { %v61_v4 = vsub.f32 %v56_v0, %v58_v2  ;;  %55 = vst.msk [vmem:[#allocation2] sm:$0xff] %vm54_vm1, %v202_v11  ;;  %p184_p10 = scmp.ne.s32.totalorder %s275_s3, %s183_s22  ;;  %p187_p11 = scmp.lt.u32.totalorder %s183_s22, %s275_s3 }
  0x38   :  { %v60_v5 = vadd.f32 1e-06, %v59_v3 }
  0x39   :  { %v62_v6 = vadd.f32 1e-06, %v61_v4  ;;  %p189_p12 = pnand %p187_p11, %p184_p10 }
  0x3a   :  { %v63_v7 = vmul.f32 %v60_v5, %v60_v5 }
  0x3b   :  { %v64_v8 = vmul.f32 %v62_v6, %v62_v6 }
  0x3d   :  { %v65_v9 = vsub.f32 %v63_v7, %v64_v8 }
  0x3e   :  { %v72_v14 = vld [vmem:[#allocation2] sm:$0xff] }
  0x3f   :  { %v67_v10 = vsel %vm66_vm0, %v65_v9, 0.0 }
  0x40   :  { %68 = vadd.xlane.f32.xlu0 %v67_v10 }
  0xcd   :  { %v69_v12 = vpop.xlane.xlu0 %68 }
  0xce   :  { %v70_v13 = vadd.f32 1.0, %v69_v12 }
  0xd0   :  { %v71_v15 = vmax.f32 %v70_v13, 0.0 }
  0xd2   :  { %v73_v16 = vadd.f32 %v72_v14, %v71_v15 }
  0xd4   :  { %75 = vst.msk [vmem:[#allocation2] sm:$0xff] %vm54_vm1, %v73_v16 }
  0xdb   :  { %v79_v17 = vld [vmem:[#allocation2] sm:$0xff] }
  0xdc   :  { %v80_v18 = vsel %vm54_vm1, %v79_v17, 0.0 }
  0xdd   :  { %81 = vadd.xlane.f32.xlu0 %v80_v18 }
 0x16a   :  { %v82_v19 = vpop.xlane.xlu0 %81 }
 0x16b   :  { %v83_v20 = vrot.slane %v82_v19, 4 }
 0x16d   :  { %v84_v21 = vadd.f32 %v83_v20, %v82_v19 }
 0x16f   :  { %v85_v22 = vrot.slane %v84_v21, 2 }
 0x171   :  { %v86_v23 = vadd.f32 %v85_v22, %v84_v21 }
 0x173   :  { %v87_v24 = vrot.slane %v86_v23, 1 }
 0x175   :  { %v88_v25 = vadd.f32 %v87_v24, %v86_v23 }
 0x177   :  { %110 = vpush %v88_v25 }
 0x1a8   :  { %s111_s2 = spop %110 }
 0x1a9   :  { %s92_s19 = smul.f32 0.125, %s111_s2 }
 0x1ab   :  { %94 = sst [smem:[#allocation9]] %s92_s19 }
 0x1ac   :  { %192 = shalt.err (!%p189_p12)
}
 0x1ad   :  { %s203_s27 = smov [#allocation9]  }
 0x1ae   :  { %102 = dma.smem_to_hbm %s203_s27, 16, %s275_s3, [#allocation5]  }
 0x1af   :  { %197 = dma.done.wait [#allocation5], 16  }
 0x1b0   :  { %198 = vsyncadd [#allocation5], 4294967280 }
 0x1b1   :  { %106 = sfence }
 0x1b2   :  { %107 = vsyncpa [#allocation4], 1 }
 0x1b3   :  { %108 = vsyncpa [#allocation7], 1 }
 0x1b4   :  { %109 = vsyncpa [#allocation5], 1 }

</bundles_post_ra>
